<compile_context>
chip_gen: v6e
topology: v6e:2x2x1
jax: 0.10.0
libtpu: 0.0.40
codegen_flags: <defaults>
</compile_context>

<pallas_src>
import functools
import math

import jax
import jax.numpy as jnp
from jax import lax
from jax.experimental import pallas as pl
from jax.experimental.pallas import tpu as pltpu


# ---------------------------------------------------------------------------
# helpers
# ---------------------------------------------------------------------------

def _swap_halves(t, half):
    """rotate_half without the sign flip (the sign is folded into the sin table)."""
    if (2 * half) % 128 == 0:
        # lane-aligned head dim: keep the half-swap in the XLU slot (free-ish).
        return pltpu.roll(t, half, axis=-1)
    return jnp.concatenate([t[..., half:], t[..., :half]], axis=-1)


def _const_spec(shape, grid_rank):
    """BlockSpec for a grid-invariant operand (weights): constant index map and,
    when supported, single-buffered so its resident VMEM footprint is 1x not 2x."""
    zero = (0,) * len(shape)
    index_map = {1: (lambda i: zero),
                 2: (lambda i, j: zero),
                 3: (lambda i, j, k: zero)}[grid_rank]
    if hasattr(pl, "Buffered"):
        try:
            return pl.BlockSpec(shape, index_map, pipeline_mode=pl.Buffered(1))
        except TypeError:   # older jax without pipeline_mode: default double-buffering
            pass
    return pl.BlockSpec(shape, index_map)


def _pick_tile(total, target):
    """Largest tile <= target (multiple-of-8 granularity) dividing `total`."""
    if total <= target:
        return total
    for cand in range(target, 7, -8):
        if total % cand == 0:
            return cand
    return total


def _vmem_limit_bytes():
    """~85% of physical VMEM, capped at 100 MiB:
    ≈100 MiB on v5e/v6e (128 MiB physical), ≈54 MiB on v7x (64 MiB per TC)."""
    try:
        cap = pltpu.get_tpu_info().vmem_capacity_bytes
        return int(min(100 * 1024 * 1024, cap * 85 // 100))
    except Exception:
        return 64 * 1024 * 1024


# ---------------------------------------------------------------------------
# kernel 1: LayerNorm + fused projections + rotary + SwiGLU feed-forward
# ---------------------------------------------------------------------------

def proj_ff_kernel(x_ref, gamma_ref, cos_ref, sin_ref,
                   wq_ref, wkv_ref, wffvg_ref, wffo_ref,
                   q_out_ref, k_out_ref, v_out_ref, ff_out_ref,
                   *, heads, dim_head, ff_inner):
    bb, tr, dim = x_ref.shape
    rows = bb * tr
    half = dim_head // 2

    # --- LayerNorm (f32, eps=1e-5, beta=0) on bb*tr rows at once ---
    x = x_ref[...].reshape(rows, dim)
    mean = jnp.mean(x, axis=-1, keepdims=True)
    xc = x - mean
    var = jnp.mean(xc * xc, axis=-1, keepdims=True)
    xn = xc * lax.rsqrt(var + 1e-5) * gamma_ref[...]
    xn_bf = xn.astype(jnp.bfloat16)

    cos = cos_ref[...]                       # (tr, dh) shared rotary tables,
    sin = sin_ref[...]                       # rotate_half sign folded into sin.

    # --- q projection (softmax scale pre-folded into wq) + rotary, all heads ---
    q = jnp.dot(xn_bf, wq_ref[...], preferred_element_type=jnp.float32)        # (rows, h*dh)
    q4 = q.reshape(bb, tr, heads, dim_head)
    q_rot = q4 * cos[None, :, None, :] + _swap_halves(q4, half) * sin[None, :, None, :]
    # stored as (bb, tr*heads, dh): exactly the attention kernel's MXU row layout,
    # so q never needs an in-kernel relayout per kv step.
    q_out_ref[...] = q_rot.reshape(bb, tr * heads, dim_head).astype(jnp.bfloat16)

    # --- fused k|v projection (one wider MXU call) + rotary on the shared k ---
    kv = jnp.dot(xn_bf, wkv_ref[...], preferred_element_type=jnp.float32)       # (rows, 2*dh)
    k3 = kv[:, :dim_head].reshape(bb, tr, dim_head)
    v3 = kv[:, dim_head:].reshape(bb, tr, dim_head)
    k_rot = k3 * cos[None] + _swap_halves(k3, half) * sin[None]
    k_out_ref[...] = k_rot.astype(jnp.bfloat16)
    v_out_ref[...] = v3.astype(jnp.bfloat16)

    # --- fused ff value|gate projection + SwiGLU + ff output projection ---
    # (kept last so the (rows, 2*ff_inner) intermediate has the shortest live range)
    ffvg = jnp.dot(xn_bf, wffvg_ref[...], preferred_element_type=jnp.float32)   # (rows, 2*ffi)
    ffv = ffvg[:, :ff_inner]
    ffg = ffvg[:, ff_inner:]
    swiglu = (ffg * jax.nn.sigmoid(ffg)) * ffv
    ff = jnp.dot(swiglu.astype(jnp.bfloat16), wffo_ref[...],
                 preferred_element_type=jnp.float32)                            # (rows, dim)
    ff_out_ref[...] = ff.reshape(bb, tr, dim)


# ---------------------------------------------------------------------------
# kernel 2: flash-style causal multi-query attention + attn_out proj + ff add
# ---------------------------------------------------------------------------

def attn_kernel(q_ref, k_ref, v_ref, ff_ref, wo_ref, o_ref,
                m_sc, l_sc, acc_sc, *, heads, dim_head, tq, tk):
    qi = pl.program_id(1)
    ki = pl.program_id(2)
    nk = pl.num_programs(2)
    q_lo = qi * tq
    k_lo = ki * tk

    @pl.when(ki == 0)
    def _init():
        m_sc[...] = jnp.full(m_sc.shape, -jnp.inf, m_sc.dtype)
        l_sc[...] = jnp.zeros(l_sc.shape, l_sc.dtype)
        acc_sc[...] = jnp.zeros(acc_sc.shape, acc_sc.dtype)

    # causal block skip: kv blocks strictly above the diagonal contribute nothing.
    @pl.when(k_lo <= q_lo + (tq - 1))
    def _visible():
        q2 = q_ref[0]                               # (tq*heads, dh) bf16, rotary+scale applied
        k2 = k_ref[0]                               # (tk, dh)       bf16, rotary applied
        sim = lax.dot_general(q2, k2, dimension_numbers=(((1,), (1,)), ((), ())),
                              preferred_element_type=jnp.float32)   # (tq*heads, tk)

        # causal mask via 3-D iota (no integer divide). Only diagonal blocks
        # strictly need it, but it is cheap VPU work under the block-skip guard.
        qpos = q_lo + lax.broadcasted_iota(jnp.int32, (tq, heads, tk), 0).reshape(tq * heads, tk)
        kpos = k_lo + lax.broadcasted_iota(jnp.int32, (tq * heads, tk), 1)
        sim = jnp.where(kpos > qpos, jnp.float32(-1e30), sim)

        m_prev = m_sc[...]
        m_new = jnp.maximum(m_prev, jnp.max(sim, axis=-1, keepdims=True))
        alpha = jnp.exp(m_prev - m_new)
        p = jnp.exp(sim - m_new)                                      # unnormalized
        l_sc[...] = alpha * l_sc[...] + jnp.sum(p, axis=-1, keepdims=True)
        acc_sc[...] = alpha * acc_sc[...] + jnp.dot(p.astype(jnp.bfloat16), v_ref[0],
                                                    preferred_element_type=jnp.float32)
        m_sc[...] = m_new

    @pl.when(ki == nk - 1)
    def _finalize():
        o_h = acc_sc[...] * pl.reciprocal(l_sc[...], approx=True)     # (tq*heads, dh)
        out_all = o_h.reshape(tq, heads * dim_head)                   # 'b h n d -> b n (h d)'
        attn = jnp.dot(out_all.astype(jnp.bfloat16), wo_ref[...],
                       preferred_element_type=jnp.float32)            # (tq, dim)
        o_ref[0] = (attn + ff_ref[0]).astype(o_ref.dtype)


# ---------------------------------------------------------------------------
# wrapper
# ---------------------------------------------------------------------------

def parallel_transformer_block(x, gamma, wf, wo, wff, *, heads, dim_head):
    b, n, dim = x.shape
    attn_inner = heads * dim_head
    ff_inner = wff.shape[0]
    scale = dim_head ** -0.5
    assert dim_head % 2 == 0

    # --- host-side weight prep (plain-JAX glue) ---
    # fused proj is (q | k | v | ff_value | ff_gate); scale folded into wq in f32.
    wq_bf = (wf[:, :attn_inner] * scale).astype(jnp.bfloat16)
    wkv_bf = wf[:, attn_inner:attn_inner + 2 * dim_head].astype(jnp.bfloat16)
    wffvg_bf = wf[:, attn_inner + 2 * dim_head:].astype(jnp.bfloat16)
    wo_bf = wo.astype(jnp.bfloat16)
    wffo_bf = wff.astype(jnp.bfloat16)
    gamma2 = gamma.reshape(1, dim).astype(jnp.float32)

    # shared rotary tables (n, dh): no heads/batch repetition.
    inv_freq = 1.0 / (10000.0 ** (jnp.arange(0, dim_head, 2, dtype=jnp.float32) / dim_head))
    freqs = jnp.arange(n, dtype=jnp.float32)[:, None] * inv_freq[None, :]
    cos = jnp.concatenate([jnp.cos(freqs), jnp.cos(freqs)], axis=-1)            # (n, dh)
    sin = jnp.concatenate([-jnp.sin(freqs), jnp.sin(freqs)], axis=-1)           # sign folded

    # --- tiling (target 256 rows per MXU call; 128 also fine on v5e) ---
    tr = _pick_tile(n, 256)                     # rows-per-step in the projection kernel
    bb = math.gcd(b, max(1, 256 // tr))         # batch elements per projection step
    tq = _pick_tile(n, 256)                     # flash q block
    tk = _pick_tile(n, 256)                     # flash kv block
    assert n % tr == 0 and n % tq == 0 and n % tk == 0 and b % bb == 0
    vmem_limit = _vmem_limit_bytes()

    # --- kernel 1: LayerNorm + projections + rotary + SwiGLU FF ---
    k1 = functools.partial(proj_ff_kernel, heads=heads, dim_head=dim_head,
                           ff_inner=ff_inner)
    q_rot, k_rot, v, ff_out = pl.pallas_call(
        k1,
        out_shape=(
            jax.ShapeDtypeStruct((b, n * heads, dim_head), jnp.bfloat16),   # q (pre-rotated)
            jax.ShapeDtypeStruct((b, n, dim_head), jnp.bfloat16),           # k (pre-rotated)
            jax.ShapeDtypeStruct((b, n, dim_head), jnp.bfloat16),           # v
            jax.ShapeDtypeStruct((b, n, dim), jnp.float32),                 # ff path output
        ),
        grid_spec=pltpu.PrefetchScalarGridSpec(
            num_scalar_prefetch=0,
            grid=(b // bb, n // tr),
            in_specs=[
                pl.BlockSpec((bb, tr, dim), lambda bi, ri: (bi, ri, 0)),    # x
                _const_spec((1, dim), 2),                                   # gamma
                pl.BlockSpec((tr, dim_head), lambda bi, ri: (ri, 0)),       # cos
                pl.BlockSpec((tr, dim_head), lambda bi, ri: (ri, 0)),       # sin (signed)
                _const_spec((dim, attn_inner), 2),                          # W_q (scaled)
                _const_spec((dim, 2 * dim_head), 2),                        # W_k|W_v fused
                _const_spec((dim, 2 * ff_inner), 2),                        # W_ff val|gate fused
                _const_spec((ff_inner, dim), 2),                            # W_ff_out
            ],
            out_specs=(
                pl.BlockSpec((bb, tr * heads, dim_head), lambda bi, ri: (bi, ri, 0)),
                pl.BlockSpec((bb, tr, dim_head), lambda bi, ri: (bi, ri, 0)),
                pl.BlockSpec((bb, tr, dim_head), lambda bi, ri: (bi, ri, 0)),
                pl.BlockSpec((bb, tr, dim), lambda bi, ri: (bi, ri, 0)),
            ),
        ),
        compiler_params=pltpu.CompilerParams(
            dimension_semantics=("parallel", "parallel"),
            vmem_limit_bytes=vmem_limit,
        ),
    )(x, gamma2, cos, sin, wq_bf, wkv_bf, wffvg_bf, wffo_bf)

    # --- kernel 2: flash-style causal multi-query attention ---
    k2 = functools.partial(attn_kernel, heads=heads, dim_head=dim_head, tq=tq, tk=tk)
    out = pl.pallas_call(
        k2,
        out_shape=jax.ShapeDtypeStruct((b, n, dim), jnp.float32),
        grid_spec=pltpu.PrefetchScalarGridSpec(
            num_scalar_prefetch=0,
            grid=(b, n // tq, n // tk),
            in_specs=[
                pl.BlockSpec((1, tq * heads, dim_head), lambda bi, qi, ki: (bi, qi, 0)),
                pl.BlockSpec((1, tk, dim_head), lambda bi, qi, ki: (bi, ki, 0)),
                pl.BlockSpec((1, tk, dim_head), lambda bi, qi, ki: (bi, ki, 0)),
                pl.BlockSpec((1, tq, dim), lambda bi, qi, ki: (bi, qi, 0)),   # ff path
                _const_spec((attn_inner, dim), 3),                            # W_attn_out
            ],
            out_specs=pl.BlockSpec((1, tq, dim), lambda bi, qi, ki: (bi, qi, 0)),
            scratch_shapes=[
                pltpu.VMEM((tq * heads, 1), jnp.float32),          # running max
                pltpu.VMEM((tq * heads, 1), jnp.float32),          # running denom
                pltpu.VMEM((tq * heads, dim_head), jnp.float32),   # running output
            ],
        ),
        compiler_params=pltpu.CompilerParams(
            dimension_semantics=("parallel", "parallel", "arbitrary"),
            vmem_limit_bytes=vmem_limit,
        ),
    )(q_rot, k_rot, v, ff_out, wo_bf)

    return out


# ---------------------------------------------------------------------------
# pure-JAX f32 reference (mirrors the PyTorch forward) for validation
# ---------------------------------------------------------------------------

def reference(x, gamma, wf, wo, wff, heads, dim_head):
    b, n, dim = x.shape
    attn_inner = heads * dim_head
    ff_inner = wff.shape[0]
    scale = dim_head ** -0.5
    half = dim_head // 2

    mean = x.mean(-1, keepdims=True)
    var = ((x - mean) ** 2).mean(-1, keepdims=True)
    xn = (x - mean) / jnp.sqrt(var + 1e-5) * gamma

    proj = xn @ wf
    q = proj[..., :attn_inner]
    k = proj[..., attn_inner:attn_inner + dim_head]
    v = proj[..., attn_inner + dim_head:attn_inner + 2 * dim_head]
    ff = proj[..., attn_inner + 2 * dim_head:]

    q = q.reshape(b, n, heads, dim_head).transpose(0, 2, 1, 3)   # b h n d

    inv_freq = 1.0 / (10000.0 ** (jnp.arange(0, dim_head, 2, dtype=jnp.float32) / dim_head))
    freqs = jnp.arange(n, dtype=jnp.float32)[:, None] * inv_freq[None, :]
    pos = jnp.concatenate([freqs, freqs], axis=-1)

    def rot_half(t):
        return jnp.concatenate([-t[..., half:], t[..., :half]], axis=-1)

    q = q * jnp.cos(pos) + rot_half(q) * jnp.sin(pos)
    k = k * jnp.cos(pos) + rot_half(k) * jnp.sin(pos)
    q = q * scale

    sim = jnp.einsum('bhid,bjd->bhij', q, k)
    mask = jnp.triu(jnp.ones((n, n), dtype=bool), 1)
    sim = jnp.where(mask, -jnp.finfo(jnp.float32).max, sim)
    attn = jax.nn.softmax(sim, axis=-1)
    out = jnp.einsum('bhij,bjd->bhid', attn, v)
    out = out.transpose(0, 2, 1, 3).reshape(b, n, attn_inner)

    ff_x, gate = ff[..., :ff_inner], ff[..., ff_inner:]
    return out @ wo + (jax.nn.silu(gate) * ff_x) @ wff


if __name__ == "__main__":
    B, N, DIM = 2, 8, 32
    HEADS, DIM_HEAD, FF_MULT = 4, 16, 4
    ATTN_INNER = HEADS * DIM_HEAD
    FF_INNER = DIM * FF_MULT
    FUSED = ATTN_INNER + 2 * DIM_HEAD + 2 * FF_INNER

    key = jax.random.PRNGKey(0)
    kx, k1, k2, k3 = jax.random.split(key, 4)
    x = jax.random.normal(kx, (B, N, DIM), jnp.float32)
    gamma = jnp.ones((DIM,), jnp.float32)
    # nn.Linear weights are (out, in); stored pre-transposed as (in, out).
    wf = 0.05 * jax.random.normal(k1, (DIM, FUSED), jnp.float32)
    wo = 0.05 * jax.random.normal(k2, (ATTN_INNER, DIM), jnp.float32)
    wff = 0.05 * jax.random.normal(k3, (FF_INNER, DIM), jnp.float32)

    out = parallel_transformer_block(x, gamma, wf, wo, wff,
                                     heads=HEADS, dim_head=DIM_HEAD)
    out = jax.block_until_ready(out)

    ref = reference(x, gamma, wf, wo, wff, HEADS, DIM_HEAD)
    assert out.shape == (B, N, DIM)
    # bf16 MXU operands / bf16 q,k,v intermediates + approx reciprocal => loose tol
    assert jnp.allclose(out, ref, atol=3e-2, rtol=3e-2), \
        f"max abs err {float(jnp.max(jnp.abs(out - ref)))}"
    print("KERNEL_OK")
</pallas_src>

<mosaic_0001>
module attributes {stable_mosaic.version = 11 : i64} {
  func.func @proj_ff_kernel(%arg0: i32, %arg1: i32, %arg2: memref<2x8x32xf32, #tpu.memory_space<vmem>>, %arg3: memref<1x32xf32, #tpu.memory_space<vmem>>, %arg4: memref<8x16xf32, #tpu.memory_space<vmem>>, %arg5: memref<8x16xf32, #tpu.memory_space<vmem>>, %arg6: memref<32x64xbf16, #tpu.memory_space<vmem>>, %arg7: memref<32x32xbf16, #tpu.memory_space<vmem>>, %arg8: memref<32x256xbf16, #tpu.memory_space<vmem>>, %arg9: memref<128x32xbf16, #tpu.memory_space<vmem>>, %arg10: memref<2x32x16xbf16, #tpu.memory_space<vmem>>, %arg11: memref<2x8x16xbf16, #tpu.memory_space<vmem>>, %arg12: memref<2x8x16xbf16, #tpu.memory_space<vmem>>, %arg13: memref<2x8x32xf32, #tpu.memory_space<vmem>>) attributes {dimension_semantics = [#tpu.dimension_semantics<parallel>, #tpu.dimension_semantics<parallel>], iteration_bounds = array<i64: 1, 1>, scalar_prefetch = 0 : i64, scratch_operands = 0 : i64, tpu.core_type = #tpu.core_type<tc>, window_params = [{transform_indices = @transform_0, window_bounds = array<i64: 2, 8, 32>}, {pipeline_mode = #tpu.pipeline_mode<synchronous>, transform_indices = @transform_1, window_bounds = array<i64: 1, 32>}, {transform_indices = @transform_2, window_bounds = array<i64: 8, 16>}, {transform_indices = @transform_3, window_bounds = array<i64: 8, 16>}, {pipeline_mode = #tpu.pipeline_mode<synchronous>, transform_indices = @transform_4, window_bounds = array<i64: 32, 64>}, {pipeline_mode = #tpu.pipeline_mode<synchronous>, transform_indices = @transform_5, window_bounds = array<i64: 32, 32>}, {pipeline_mode = #tpu.pipeline_mode<synchronous>, transform_indices = @transform_6, window_bounds = array<i64: 32, 256>}, {pipeline_mode = #tpu.pipeline_mode<synchronous>, transform_indices = @transform_7, window_bounds = array<i64: 128, 32>}, {transform_indices = @transform_8, window_bounds = array<i64: 2, 32, 16>}, {transform_indices = @transform_9, window_bounds = array<i64: 2, 8, 16>}, {transform_indices = @transform_10, window_bounds = array<i64: 2, 8, 16>}, {transform_indices = @transform_11, window_bounds = array<i64: 2, 8, 32>}]} {
    %c0 = arith.constant 0 : index
    %c0_0 = arith.constant 0 : index
    %c0_1 = arith.constant 0 : index
    %0 = vector.load %arg2[%c0, %c0_0, %c0_1] : memref<2x8x32xf32, #tpu.memory_space<vmem>>, vector<2x8x32xf32>
    %1 = vector.shape_cast %0 : vector<2x8x32xf32> to vector<16x32xf32>
    %cst = arith.constant dense<0.000000e+00> : vector<16xf32>
    %2 = vector.multi_reduction <add>, %1, %cst [1] : vector<16x32xf32> to vector<16xf32>
    %3 = vector.shape_cast %2 : vector<16xf32> to vector<16x1xf32>
    %cst_2 = arith.constant 3.200000e+01 : f32
    %4 = vector.broadcast %cst_2 : f32 to vector<16x1xf32>
    %5 = arith.divf %3, %4 : vector<16x1xf32>
    %6 = vector.broadcast %5 : vector<16x1xf32> to vector<16x32xf32>
    %7 = arith.subf %1, %6 : vector<16x32xf32>
    %8 = arith.mulf %7, %7 : vector<16x32xf32>
    %cst_3 = arith.constant dense<0.000000e+00> : vector<16xf32>
    %9 = vector.multi_reduction <add>, %8, %cst_3 [1] : vector<16x32xf32> to vector<16xf32>
    %10 = vector.shape_cast %9 : vector<16xf32> to vector<16x1xf32>
    %cst_4 = arith.constant 3.200000e+01 : f32
    %11 = vector.broadcast %cst_4 : f32 to vector<16x1xf32>
    %12 = arith.divf %10, %11 : vector<16x1xf32>
    %cst_5 = arith.constant 9.99999974E-6 : f32
    %13 = vector.broadcast %cst_5 : f32 to vector<16x1xf32>
    %14 = arith.addf %12, %13 : vector<16x1xf32>
    %15 = math.rsqrt %14 : vector<16x1xf32>
    %16 = vector.broadcast %15 : vector<16x1xf32> to vector<16x32xf32>
    %17 = arith.mulf %7, %16 : vector<16x32xf32>
    %c0_6 = arith.constant 0 : index
    %c0_7 = arith.constant 0 : index
    %18 = vector.load %arg3[%c0_6, %c0_7] : memref<1x32xf32, #tpu.memory_space<vmem>>, vector<1x32xf32>
    %19 = vector.broadcast %18 : vector<1x32xf32> to vector<16x32xf32>
    %20 = arith.mulf %17, %19 : vector<16x32xf32>
    %21 = arith.truncf %20 : vector<16x32xf32> to vector<16x32xbf16>
    %c0_8 = arith.constant 0 : index
    %c0_9 = arith.constant 0 : index
    %22 = vector.load %arg4[%c0_8, %c0_9] : memref<8x16xf32, #tpu.memory_space<vmem>>, vector<8x16xf32>
    %c0_10 = arith.constant 0 : index
    %c0_11 = arith.constant 0 : index
    %23 = vector.load %arg5[%c0_10, %c0_11] : memref<8x16xf32, #tpu.memory_space<vmem>>, vector<8x16xf32>
    %c0_12 = arith.constant 0 : index
    %c0_13 = arith.constant 0 : index
    %24 = vector.load %arg6[%c0_12, %c0_13] : memref<32x64xbf16, #tpu.memory_space<vmem>>, vector<32x64xbf16>
    %cst_14 = arith.constant dense<0.000000e+00> : vector<16x64xf32>
    %25 = tpu.matmul %21, %24, %cst_14 {dimension_numbers = #tpu.dot_dimension_numbers<[1], [0], [0], [1], [0, 0, 1, 1], [], []>} : vector<16x32xbf16>, vector<32x64xbf16>, vector<16x64xf32> -> vector<16x64xf32>
    %26 = vector.shape_cast %25 : vector<16x64xf32> to vector<2x8x4x16xf32>
    %27 = vector.shape_cast %22 : vector<8x16xf32> to vector<1x8x1x16xf32>
    %28 = vector.broadcast %27 : vector<1x8x1x16xf32> to vector<2x8x4x16xf32>
    %29 = arith.mulf %26, %28 : vector<2x8x4x16xf32>
    %30 = vector.extract_strided_slice %26 {offsets = [0, 0, 0, 8], sizes = [2, 8, 4, 8], strides = [1, 1, 1, 1]} : vector<2x8x4x16xf32> to vector<2x8x4x8xf32>
    %31 = vector.extract_strided_slice %26 {offsets = [0, 0, 0, 0], sizes = [2, 8, 4, 8], strides = [1, 1, 1, 1]} : vector<2x8x4x16xf32> to vector<2x8x4x8xf32>
    %32 = tpu.concatenate %30, %31 in 3 : vector<2x8x4x8xf32>, vector<2x8x4x8xf32> -> vector<2x8x4x16xf32>
    %33 = vector.shape_cast %23 : vector<8x16xf32> to vector<1x8x1x16xf32>
    %34 = vector.broadcast %33 : vector<1x8x1x16xf32> to vector<2x8x4x16xf32>
    %35 = arith.mulf %32, %34 : vector<2x8x4x16xf32>
    %36 = arith.addf %29, %35 : vector<2x8x4x16xf32>
    %37 = vector.shape_cast %36 : vector<2x8x4x16xf32> to vector<2x32x16xf32>
    %38 = arith.truncf %37 : vector<2x32x16xf32> to vector<2x32x16xbf16>
    %c0_15 = arith.constant 0 : index
    %c0_16 = arith.constant 0 : index
    %c0_17 = arith.constant 0 : index
    %39 = vector.load %arg10[%c0_15, %c0_16, %c0_17] : memref<2x32x16xbf16, #tpu.memory_space<vmem>>, vector<2x32x16xbf16>
    tpu.vector_store %arg10[%c0_15, %c0_16, %c0_17], %38 {strides = array<i32>} : memref<2x32x16xbf16, #tpu.memory_space<vmem>>, vector<2x32x16xbf16>,
    %c0_18 = arith.constant 0 : index
    %c0_19 = arith.constant 0 : index
    %40 = vector.load %arg7[%c0_18, %c0_19] : memref<32x32xbf16, #tpu.memory_space<vmem>>, vector<32x32xbf16>
    %cst_20 = arith.constant dense<0.000000e+00> : vector<16x32xf32>
    %41 = tpu.matmul %21, %40, %cst_20 {dimension_numbers = #tpu.dot_dimension_numbers<[1], [0], [0], [1], [0, 0, 1, 1], [], []>} : vector<16x32xbf16>, vector<32x32xbf16>, vector<16x32xf32> -> vector<16x32xf32>
    %42 = vector.extract_strided_slice %41 {offsets = [0, 0], sizes = [16, 16], strides = [1, 1]} : vector<16x32xf32> to vector<16x16xf32>
    %43 = vector.shape_cast %42 : vector<16x16xf32> to vector<2x8x16xf32>
    %44 = vector.extract_strided_slice %41 {offsets = [0, 16], sizes = [16, 16], strides = [1, 1]} : vector<16x32xf32> to vector<16x16xf32>
    %45 = vector.shape_cast %44 : vector<16x16xf32> to vector<2x8x16xf32>
    %46 = vector.shape_cast %22 : vector<8x16xf32> to vector<1x8x16xf32>
    %47 = vector.broadcast %46 : vector<1x8x16xf32> to vector<2x8x16xf32>
    %48 = arith.mulf %43, %47 : vector<2x8x16xf32>
    %49 = vector.extract_strided_slice %43 {offsets = [0, 0, 8], sizes = [2, 8, 8], strides = [1, 1, 1]} : vector<2x8x16xf32> to vector<2x8x8xf32>
    %50 = vector.extract_strided_slice %43 {offsets = [0, 0, 0], sizes = [2, 8, 8], strides = [1, 1, 1]} : vector<2x8x16xf32> to vector<2x8x8xf32>
    %51 = tpu.concatenate %49, %50 in 2 : vector<2x8x8xf32>, vector<2x8x8xf32> -> vector<2x8x16xf32>
    %52 = vector.shape_cast %23 : vector<8x16xf32> to vector<1x8x16xf32>
    %53 = vector.broadcast %52 : vector<1x8x16xf32> to vector<2x8x16xf32>
    %54 = arith.mulf %51, %53 : vector<2x8x16xf32>
    %55 = arith.addf %48, %54 : vector<2x8x16xf32>
    %56 = arith.truncf %55 : vector<2x8x16xf32> to vector<2x8x16xbf16>
    %c0_21 = arith.constant 0 : index
    %c0_22 = arith.constant 0 : index
    %c0_23 = arith.constant 0 : index
    %57 = vector.load %arg11[%c0_21, %c0_22, %c0_23] : memref<2x8x16xbf16, #tpu.memory_space<vmem>>, vector<2x8x16xbf16>
    tpu.vector_store %arg11[%c0_21, %c0_22, %c0_23], %56 {strides = array<i32>} : memref<2x8x16xbf16, #tpu.memory_space<vmem>>, vector<2x8x16xbf16>,
    %58 = arith.truncf %45 : vector<2x8x16xf32> to vector<2x8x16xbf16>
    %c0_24 = arith.constant 0 : index
    %c0_25 = arith.constant 0 : index
    %c0_26 = arith.constant 0 : index
    %59 = vector.load %arg12[%c0_24, %c0_25, %c0_26] : memref<2x8x16xbf16, #tpu.memory_space<vmem>>, vector<2x8x16xbf16>
    tpu.vector_store %arg12[%c0_24, %c0_25, %c0_26], %58 {strides = array<i32>} : memref<2x8x16xbf16, #tpu.memory_space<vmem>>, vector<2x8x16xbf16>,
    %c0_27 = arith.constant 0 : index
    %c0_28 = arith.constant 0 : index
    %60 = vector.load %arg8[%c0_27, %c0_28] : memref<32x256xbf16, #tpu.memory_space<vmem>>, vector<32x256xbf16>
    %cst_29 = arith.constant dense<0.000000e+00> : vector<16x256xf32>
    %61 = tpu.matmul %21, %60, %cst_29 {dimension_numbers = #tpu.dot_dimension_numbers<[1], [0], [0], [1], [0, 0, 1, 1], [], []>} : vector<16x32xbf16>, vector<32x256xbf16>, vector<16x256xf32> -> vector<16x256xf32>
    %62 = vector.extract_strided_slice %61 {offsets = [0, 0], sizes = [16, 128], strides = [1, 1]} : vector<16x256xf32> to vector<16x128xf32>
    %63 = vector.extract_strided_slice %61 {offsets = [0, 128], sizes = [16, 128], strides = [1, 1]} : vector<16x256xf32> to vector<16x128xf32>
    %64 = arith.negf %63 : vector<16x128xf32>
    %65 = math.exp %64 : vector<16x128xf32>
    %cst_30 = arith.constant 1.000000e+00 : f32
    %66 = vector.broadcast %cst_30 : f32 to vector<16x128xf32>
    %67 = arith.addf %66, %65 : vector<16x128xf32>
    %68 = arith.divf %66, %67 : vector<16x128xf32>
    %69 = arith.mulf %63, %68 : vector<16x128xf32>
    %70 = arith.mulf %69, %62 : vector<16x128xf32>
    %71 = arith.truncf %70 : vector<16x128xf32> to vector<16x128xbf16>
    %c0_31 = arith.constant 0 : index
    %c0_32 = arith.constant 0 : index
    %72 = vector.load %arg9[%c0_31, %c0_32] : memref<128x32xbf16, #tpu.memory_space<vmem>>, vector<128x32xbf16>
    %cst_33 = arith.constant dense<0.000000e+00> : vector<16x32xf32>
    %73 = tpu.matmul %71, %72, %cst_33 {dimension_numbers = #tpu.dot_dimension_numbers<[1], [0], [0], [1], [0, 0, 1, 1], [], []>} : vector<16x128xbf16>, vector<128x32xbf16>, vector<16x32xf32> -> vector<16x32xf32>
    %74 = vector.shape_cast %73 : vector<16x32xf32> to vector<2x8x32xf32>
    %c0_34 = arith.constant 0 : index
    %c0_35 = arith.constant 0 : index
    %c0_36 = arith.constant 0 : index
    %75 = vector.load %arg13[%c0_34, %c0_35, %c0_36] : memref<2x8x32xf32, #tpu.memory_space<vmem>>, vector<2x8x32xf32>
    tpu.vector_store %arg13[%c0_34, %c0_35, %c0_36], %74 {strides = array<i32>} : memref<2x8x32xf32, #tpu.memory_space<vmem>>, vector<2x8x32xf32>,
    return
  }
  func.func @transform_0(%arg0: i32, %arg1: i32) -> (i32, i32, i32) {
    %c0_i32 = arith.constant 0 : i32
    %c0_i32_0 = arith.constant 0 : i32
    return %arg0, %arg1, %c0_i32 : i32, i32, i32
  }
  func.func @transform_1(%arg0: i32, %arg1: i32) -> (i32, i32) {
    %c0_i32 = arith.constant 0 : i32
    %c0_i32_0 = arith.constant 0 : i32
    %c0_i32_1 = arith.constant 0 : i32
    return %c0_i32, %c0_i32_0 : i32, i32
  }
  func.func @transform_2(%arg0: i32, %arg1: i32) -> (i32, i32) {
    %c0_i32 = arith.constant 0 : i32
    %c0_i32_0 = arith.constant 0 : i32
    return %arg1, %c0_i32 : i32, i32
  }
  func.func @transform_3(%arg0: i32, %arg1: i32) -> (i32, i32) {
    %c0_i32 = arith.constant 0 : i32
    %c0_i32_0 = arith.constant 0 : i32
    return %arg1, %c0_i32 : i32, i32
  }
  func.func @transform_4(%arg0: i32, %arg1: i32) -> (i32, i32) {
    %c0_i32 = arith.constant 0 : i32
    %c0_i32_0 = arith.constant 0 : i32
    %c0_i32_1 = arith.constant 0 : i32
    return %c0_i32, %c0_i32_0 : i32, i32
  }
  func.func @transform_5(%arg0: i32, %arg1: i32) -> (i32, i32) {
    %c0_i32 = arith.constant 0 : i32
    %c0_i32_0 = arith.constant 0 : i32
    %c0_i32_1 = arith.constant 0 : i32
    return %c0_i32, %c0_i32_0 : i32, i32
  }
  func.func @transform_6(%arg0: i32, %arg1: i32) -> (i32, i32) {
    %c0_i32 = arith.constant 0 : i32
    %c0_i32_0 = arith.constant 0 : i32
    %c0_i32_1 = arith.constant 0 : i32
    return %c0_i32, %c0_i32_0 : i32, i32
  }
  func.func @transform_7(%arg0: i32, %arg1: i32) -> (i32, i32) {
    %c0_i32 = arith.constant 0 : i32
    %c0_i32_0 = arith.constant 0 : i32
    %c0_i32_1 = arith.constant 0 : i32
    return %c0_i32, %c0_i32_0 : i32, i32
  }
  func.func @transform_8(%arg0: i32, %arg1: i32) -> (i32, i32, i32) {
    %c0_i32 = arith.constant 0 : i32
    %c0_i32_0 = arith.constant 0 : i32
    return %arg0, %arg1, %c0_i32 : i32, i32, i32
  }
  func.func @transform_9(%arg0: i32, %arg1: i32) -> (i32, i32, i32) {
    %c0_i32 = arith.constant 0 : i32
    %c0_i32_0 = arith.constant 0 : i32
    return %arg0, %arg1, %c0_i32 : i32, i32, i32
  }
  func.func @transform_10(%arg0: i32, %arg1: i32) -> (i32, i32, i32) {
    %c0_i32 = arith.constant 0 : i32
    %c0_i32_0 = arith.constant 0 : i32
    return %arg0, %arg1, %c0_i32 : i32, i32, i32
  }
  func.func @transform_11(%arg0: i32, %arg1: i32) -> (i32, i32, i32) {
    %c0_i32 = arith.constant 0 : i32
    %c0_i32_0 = arith.constant 0 : i32
    return %arg0, %arg1, %c0_i32 : i32, i32, i32
  }
}

</mosaic_0001>

<bundles_post_ra>
// kernel: tpu_custom_call.1
= control target key start
LH: loop header
LB: loop body
LE: loop exit
PB: predicated region body
PF: predicated region fallthrough
CT: control target
= control target key end

     0   :  { %17 = vsyncpa [#allocation3], 0  ;;  %s1786_s0 = inlined_call_operand.vmem [shape: f32[2,8,32], index: 0, kind: input, shape index: {}]   ;;  %s1787_s1 = inlined_call_operand.vmem [shape: f32[1,32], index: 1, kind: input, shape index: {}]   ;;  %s1788_s2 = inlined_call_operand.hbm [shape: f32[8,16], index: 2, kind: input, shape index: {}]   ;;  %s1789_s3 = inlined_call_operand.hbm [shape: f32[8,16], index: 3, kind: input, shape index: {}]   ;;  %s1790_s4 = inlined_call_operand.vmem [shape: bf16[32,64], index: 4, kind: input, shape index: {}]   ;;  %s1791_s5 = inlined_call_operand.vmem [shape: bf16[32,32], index: 5, kind: input, shape index: {}]   ;;  %s1792_s6 = inlined_call_operand.vmem [shape: bf16[32,256], index: 6, kind: input, shape index: {}]   ;;  %s1793_s7 = inlined_call_operand.vmem [shape: bf16[128,32], index: 7, kind: input, shape index: {}]   ;;  %s1794_s8 = inlined_call_operand.vmem [shape: bf16[2,32,16], index: 8, kind: output, shape index: {0}]   ;;  %s1795_s9 = inlined_call_operand.hbm [shape: bf16[2,8,16], index: 9, kind: output, shape index: {1}]   ;;  %s1796_s10 = inlined_call_operand.hbm [shape: bf16[2,8,16], index: 10, kind: output, shape index: {2}]   ;;  %s1797_s11 = inlined_call_operand.hbm [shape: f32[2,8,32], index: 11, kind: output, shape index: {3}]  }
   0x1   :  { %18 = vsyncpa [#allocation6], 0 }
   0x2   :  { %19 = vsyncpa [#allocation4], 0 }
   0x3   :  { %20 = vsyncpa [#allocation9], 0  ;;  %s1342_s17 = smov [#allocation2]   ;;  %s1343_s19 = smov [#allocation5]  }
   0x4   :  { %s31_s18 = sshll.u32 %s1342_s17, 4  ;;  %s41_s20 = sshll.u32 %s1343_s19, 4  ;;  %s32_s18 = int_to_ptr.vmem [resolvable:$true] %s31_s18  ;;  %s42_s20 = int_to_ptr.vmem [resolvable:$true] %s41_s20 }
   0x5   :  { %s1242_s21 = scalar_lea.vmem %s32_s18, 128  ;;  %p1247_p1 = scmp.lt.s32.totalorder %s32_s18, %s32_s18 }
   0x6   :  { %p1243_p0 = scmp.ne.s32.totalorder %s32_s18, %s1242_s21  ;;  %p1248_p2 = scmp.lt.s32.totalorder %s1242_s21, %s1242_s21 }
   0x8   :  { %p1249_p3 = por %p1248_p2, %p1247_p1 }
   0xa   :  { %p1250_p4 = pnand %p1249_p3, %p1243_p0 }
   0xc   :  { %1253 = shalt.err (!%p1250_p4)
}
   0xd   :  { %34 = dma.hbm_to_vmem [thread:$0]  %s1788_s2, 128, %s32_s18, [#allocation3]  }
   0xe   :  { %s1262_s24 = scalar_lea.vmem %s42_s20, 128  ;;  %p1267_p6 = scmp.lt.s32.totalorder %s42_s20, %s42_s20 }
   0xf   :  { %p1263_p5 = scmp.ne.s32.totalorder %s42_s20, %s1262_s24  ;;  %p1268_p7 = scmp.lt.s32.totalorder %s1262_s24, %s1262_s24 }
  0x11   :  { %p1269_p8 = por %p1268_p7, %p1267_p6 }
  0x13   :  { %p1270_p9 = pnand %p1269_p8, %p1263_p5 }
  0x15   :  { %1273 = shalt.err (!%p1270_p9)
}
  0x16   :  { %44 = dma.hbm_to_vmem [thread:$0]  %s1789_s3, 128, %s42_s20, [#allocation6]  }
  0x17   :  { %1334 = dma.done.wait [#allocation3], 128  }
  0x18   :  { %1335 = vsyncadd [#allocation3], 4294967168 }
  0x19   :  { %1336 = dma.done.wait [#allocation6], 128  }
  0x1a   :  { %1337 = vsyncadd [#allocation6], 4294967168  ;;  %vm62_vm0 = vcmask 261120   ;;  %v60_v0 = vld [vmem:[%s1786_s0] sm:$0xff]  ;;  %v61_v1 = vld [vmem:[%s1786_s0 + $0x8] sm:$0xff]  ;;  %v1344_v15 = vmov 0.0  }
  0x1b   :  { %v63_v2 = vsel %vm62_vm0, %v60_v0, 0.0  ;;  %v66_v3 = vsel %vm62_vm0, %v61_v1, 0.0  ;;  %v1203_v14 = vld [vmem:[%s1790_s4 + $0x8] sm:$0xff]   ;;  %1148 = vmatprep.subr.bf16.mxu0 %v1344_v15  ;;  %vm1345_vm1 = vmmov 0   ;;  %v1204_v16 = vld [vmem:[%s1790_s4] sm:$0xff]   ;;  %1164 = vmatprep.subr.bf16.mxu1 %v1344_v15  ;;  %v1346_v37 = vmov 0  }
  0x1c   :  { %64 = vadd.xlane.f32.xlu0 %v63_v2  ;;  %1152 = vmatprep.mubr.msk.bf16.mxu0 %vm1345_vm1, %v1344_v15  ;;  %v1091_v26 = vld [vmem:[%s1787_s1] ss:$0 sm:$0xff]  ;;  %v1205_v30 = vld [vmem:[%s1791_s5 + $0x8] sm:$0xff]   ;;  %v1209_v33 = vld [vmem:[%s1792_s6 + $0x14] ss:$8 sps:$4 sm:$0xff]   ;;  %s1347_s16 = smov 96  }
  0x1d   :  { %1149 = vmatpush3.bf16.msra.mxu0 %v1203_v14  ;;  %1180 = vmatprep.mubr.msk.bf16.mxu1 %vm1345_vm1, %v1344_v15  ;;  %v1206_v32 = vld [vmem:[%s1791_s5] sm:$0xff]   ;;  %v1207_v34 = vld [vmem:[%s1792_s6 + $0x10] ss:$8 sps:$4 sm:$0xff]   ;;  %v1216_v40 = vld [vmem:[%s1793_s7 + $0x28] sm:$0xff]   ;;  %s1348_s17 = smov 112   ;;  %s1349_s1 = smov 80  }
  0x1e   :  { %1150 = vmatprep.subr.bf16.mxu0 %v1344_v15  ;;  %v1212_v35 = vld [vmem:[%s1792_s6 + $0x4] ss:$8 sps:$4 sm:$0xff]   ;;  %v1210_v36 = vld [vmem:[%s1792_s6] ss:$8 sps:$4 sm:$0xff]   ;;  %v1214_v38 = vld [vmem:[%s1793_s7 + $0x38] sm:$0xff]   ;;  %s1354_s18 = smov 8  }
  0x1f   :  { %1165 = vmatpush3.bf16.msra.mxu1 %v1214_v38  ;;  %v1215_v39 = vld [vmem:[%s1793_s7 + $0x30] sm:$0xff]   ;;  %v1217_v41 = vld [vmem:[%s1793_s7 + $0x20] sm:$0xff]   ;;  %v1218_v42 = vld [vmem:[%s1793_s7 + $0x18] sm:$0xff]   ;;  %v1352_v14 = vmov 1983009808   ;;  %vm536_vm2 = vcmask 64512  }
  0x20   :  { %67 = vadd.xlane.f32.xlu0 %v66_v3  ;;  %1166 = vmatprep.subr.bf16.mxu1 %v1344_v15  ;;  %v1219_v43 = vld [vmem:[%s1793_s7 + $0x10] sm:$0xff]   ;;  %v1220_v44 = vld [vmem:[%s1793_s7 + $0x8] sm:$0xff]   ;;  %v1221_v45 = vld [vmem:[%s1793_s7] sm:$0xff]   ;;  %s1350_s7 = smov 120   ;;  %vm739_vm3 = vcmask 125952   ;;  %s1355_s2 = smov [#allocation8]  }
  0x21   :  { %1151 = vmatpush3.bf16.msra.mxu0 %v1204_v16  ;;  %v185_v16 = vunpack.c.l.s4 %v1352_v14  ;;  %s1057_s29 = sshll.u32 %s1355_s2, 4  ;;  %s1356_s0 = smov [#allocation10]   ;;  %s1058_s29 = int_to_ptr.vmem [resolvable:$true] %s1057_s29 }
  0x22   :  { %1156 = vmatprep.subr.bf16.mxu0 %v1344_v15  ;;  %s1069_s3 = sshll.u32 %s1356_s0, 4  ;;  %s1357_s4 = smov [#allocation7]   ;;  %s1070_s3 = int_to_ptr.vmem [resolvable:$true] %s1069_s3 }
  0x23   :  { %1167 = vmatpush3.bf16.msra.mxu1 %v1215_v39  ;;  %s1045_s13 = sshll.u32 %s1357_s4, 4  ;;  %p1279_p11 = scmp.lt.s32.totalorder %s1058_s29, %s1058_s29  ;;  %s1763_s13 = int_to_ptr.vmem [resolvable:$true] %s1045_s13 }
  0x24   :  { %1168 = vmatprep.subr.bf16.mxu1 %v1344_v15 }
  0x27   :  { %1169 = vmatpush3.bf16.msra.mxu1 %v1216_v40 }
  0x28   :  { %1170 = vmatprep.subr.bf16.mxu1 %v1344_v15 }
  0x2b   :  { %1171 = vmatpush3.bf16.msra.mxu1 %v1217_v41 }
  0x2c   :  { %1172 = vmatprep.subr.bf16.mxu1 %v1344_v15 }
  0x2f   :  { %1173 = vmatpush3.bf16.msra.mxu1 %v1218_v42 }
  0x30   :  { %1174 = vmatprep.subr.bf16.mxu1 %v1344_v15 }
  0x33   :  { %1175 = vmatpush3.bf16.msra.mxu1 %v1219_v43 }
  0x34   :  { %1176 = vmatprep.subr.bf16.mxu1 %v1344_v15 }
  0x37   :  { %1177 = vmatpush3.bf16.msra.mxu1 %v1220_v44 }
  0x38   :  { %1178 = vmatprep.subr.bf16.mxu1 %v1344_v15 }
  0x3b   :  { %1179 = vmatpush3.bf16.msra.mxu1 %v1221_v45 }
  0xa5   :  { %v65_v4 = vpop.xlane.xlu0 %64 }
  0xa6   :  { %v70_v5 = vmul.f32 0.03125, %v65_v4 }
  0xa8   :  { %v72_v6 = vsub.f32 %v60_v0, %v70_v5 }
  0xa9   :  { %v68_v7 = vpop.xlane.xlu0 %67 }
  0xaa   :  { %v71_v8 = vmul.f32 0.03125, %v68_v7  ;;  %v74_v9 = vmul.f32 %v72_v6, %v72_v6  ;;  %v1351_v7 = vmov 1966171168  }
  0xac   :  { %v73_v10 = vsub.f32 %v61_v1, %v71_v8  ;;  %v76_v11 = vsel %vm62_vm0, %v74_v9, 0.0  ;;  %v321_v8 = vunpack.c.l.s4 %v1351_v7  ;;  %v187_v9 = vlaneseq }
  0xad   :  { %77 = vadd.xlane.f32.xlu1 %v76_v11 }
  0xae   :  { %v75_v12 = vmul.f32 %v73_v10, %v73_v10  ;;  %v188_v11 = vshrl.u32 %v187_v9, 7 }
  0xb0   :  { %v79_v13 = vsel %vm62_vm0, %v75_v12, 0.0 }
  0xb1   :  { %80 = vadd.xlane.f32.xlu1 %v79_v13  ;;  %v1531_v13 = vld [vmem:[#allocation2] sm:$0xff] }
 0x136   :  { %v78_v17 = vpop.xlane.xlu1 %77 }
 0x137   :  { %v82_v18 = vmul.f32 0.03125, %v78_v17  ;;  %v319_v17 = vcombine.high %v1531_v13, %v1531_v13 }
 0x139   :  { %v84_v19 = vadd.f32 1e-05, %v82_v18 }
 0x13a   :  { %v81_v20 = vpop.xlane.xlu1 %80 }
 0x13b   :  { %1222 = vrsqrt.f32 %v84_v19  ;;  %v83_v21 = vmul.f32 0.03125, %v81_v20  ;;  %v1353_v19 = vmov 1934713408  }
 0x13c   :  { %v217_v20 = vunpack.c.l.s4 %v1353_v19 }
 0x13d   :  { %v85_v22 = vadd.f32 1e-05, %v83_v21  ;;  %v186_v21 = vunpack.c.0.s8 %v185_v16 }
 0x13f   :  { %1224 = vrsqrt.f32 %v85_v22 }
 0x148   :  { %v1223_v23 = vpop.eup %1222 }
 0x149   :  { %v88_v24 = vmul.f32 %v1223_v23, %v72_v6 }
 0x14b   :  { %v97_v28 = vmul.f32 %v1091_v26, %v88_v24 }
 0x14c   :  { %v1225_v25 = vpop.eup %1224 }
 0x14d   :  { %v89_v27 = vmul.f32 %v1225_v25, %v73_v10  ;;  %v322_v10 = vunpack.c.0.s8 %v321_v8 }
 0x14f   :  { %v98_v29 = vmul.f32 %v1091_v26, %v89_v27  ;;  %v1529_v12 = vsub.s32 %v322_v10, %v188_v11  ;;  %v218_v26 = vunpack.c.0.s8 %v217_v20 }
 0x151   :  { %v99_v31 = vpack.c.bf16 %v98_v29, %v97_v28  ;;  %v326_v18 = vrot.slane %v1531_v13, %v1529_v12  ;;  %v333_v25 = vrot.slane %v319_v17, %v1529_v12  ;;  %v189_v28 = vsub.s32 %v186_v21, %v188_v11 }
 0x152   :  { %v221_v39 = vsub.s32 %v218_v26, %v188_v11 }
 0x153   :  { %1153 = vmatmul.mubr.msk.bf16.vlgmr.msra.gmra.mxu0 %vm62_vm0, %v99_v31  ;;  %v334_v24 = vcombine.high %v326_v18, %v326_v18  ;;  %v342_v27 = vrot.slane %v326_v18, %v1529_v12 }
 0x154   :  { %1157 = vmatpush3.bf16.msra.mxu0 %v1205_v30  ;;  %1160 = vmatprep.mubr.msk.bf16.mxu0 %vm1345_vm1, %v1344_v15 }
 0x155   :  { %1158 = vmatprep.subr.bf16.mxu0 %v1344_v15  ;;  %v364_v40 = vcombine.high %v342_v27, %v342_v27 }
 0x158   :  { %1159 = vmatpush3.bf16.msra.mxu0 %v1206_v32 }
 0x159   :  { %883 = vmatprep.subr.bf16.mxu0 %v1209_v33  ;;  %v1541_v33 = vsub.s32 0, %v188_v11 }
 0x15b   :  { %1161 = vmatmul.mubr.msk.bf16.vlgmr.msra.gmra.mxu0 %vm62_vm0, %v99_v31 }
 0x15c   :  { %884 = vmatpush1.bf16.msra.mxu0 %v1207_v34  ;;  %903 = vmatprep.mubr.bf16.mxu0 %v1346_v37  ;;  %v356_v34 = vrot.slane %v334_v24, %v1529_v12 }
 0x15d   :  { %885 = vmatprep.subr.bf16.mxu0 %v1212_v35  ;;  %v349_v35 = vrot.slane %v333_v25, %v1529_v12 }
 0x160   :  { %886 = vmatpush1.bf16.msra.mxu0 %v1210_v36  ;;  %v335_v36 = vcombine.high %v333_v25, %v333_v25 }
 0x163   :  { %1112 = vmatmul.mubr.msk.bf16.vlgmr.msra.gmra.mxu0 %vm62_vm0, %v99_v31 }
 0x213   :  { %v1509_v46 = vpop.f32.mrf.mxu0 }
 0x214   :  { %170 = vrot.lane.b32.xlu1 %v1509_v46, %s1347_s16  ;;  %164 = vrot.lane.b32.xlu0 %v1509_v46, %s1348_s17 }
 0x215   :  { %v1154_v47 = vpop.f32.mrf.mxu0 }
 0x216   :  { %v366_v47 = vcombine.high %v356_v34, %v356_v34 }
 0x217   :  { %v1514_v48 = vpop.f32.mrf.mxu0 }
 0x218   :  { %176 = vrot.lane.b32.xlu0 %v1509_v46, %s1349_s1  ;;  %166 = vrot.lane.b32.xlu1 %v1514_v48, %s1348_s17 }
 0x219   :  { %v1155_v49 = vpop.f32.mrf.mxu0 }
 0x21a   :  { %v363_v49 = vrot.slane %v335_v36, %v1529_v12 }
 0x21b   :  { %v1519_v50 = vpop.f32.mrf.mxu0 }
 0x21c   :  { %172 = vrot.lane.b32.xlu1 %v1514_v48, %s1347_s16  ;;  %809 = vrot.lane.b32.xlu0 %v1519_v50, %s1350_s7  ;;  %v391_v14 = vrot.slane %v363_v49, %v1541_v33  ;;  %s1274_s16 = scalar_lea.vmem %s1058_s29, 128 }
 0x21d   :  { %v1162_v51 = vpop.f32.mrf.mxu0  ;;  %p1275_p10 = scmp.ne.s32.totalorder %s1058_s29, %s1274_s16  ;;  %p1280_p12 = scmp.lt.s32.totalorder %s1274_s16, %s1274_s16 }
 0x21e   :  { %v365_v51 = vcombine.high %v349_v35, %v349_v35 }
 0x21f   :  { %v1524_v52 = vpop.f32.mrf.mxu0  ;;  %p1281_p13 = por %p1280_p12, %p1279_p11 }
 0x220   :  { %178 = vrot.lane.b32.xlu1 %v1514_v48, %s1349_s1 }
 0x221   :  { %v1163_v53 = vpop.f32.mrf.mxu0  ;;  %p1282_p0 = pnand %p1281_p13, %p1275_p10 }
 0x223   :  { %v905_v54 = vpop.f32.mrf.mxu0 }
 0x224   :  { %811 = vrot.lane.b32.xlu1 %v1524_v52, %s1350_s7 }
 0x225   :  { %v907_v55 = vpop.f32.mrf.mxu0 }
 0x226   :  { %v1113_v56 = vmul.f32 -1.442695, %v907_v55 }
 0x227   :  { %v909_v57 = vpop.f32.mrf.mxu0 }
 0x228   :  { %1226 = vpow2.f32 %v1113_v56 }
 0x229   :  { %v911_v58 = vpop.f32.mrf.mxu0 }
 0x22a   :  { %v1114_v59 = vmul.f32 -1.442695, %v911_v58 }
 0x22c   :  { %1228 = vpow2.f32 %v1114_v59  ;;  %v379_v59 = vrot.slane %v364_v40, %v1541_v33 }
 0x235   :  { %v1227_v60 = vpop.eup %1226 }
 0x236   :  { %v920_v61 = vadd.f32 1.0, %v1227_v60  ;;  %v387_v60 = vrot.slane %v349_v35, %v1541_v33 }
 0x238   :  { %1230 = vrcp.f32 %v920_v61 }
 0x239   :  { %v1229_v62 = vpop.eup %1228 }
 0x23a   :  { %v921_v63 = vadd.f32 1.0, %v1229_v62 }
 0x23c   :  { %1232 = vrcp.f32 %v921_v63 }
 0x245   :  { %v1231_v0 = vpop.eup %1230 }
 0x246   :  { %v926_v1 = vmul.f32 %v1231_v0, %v907_v55 }
 0x248   :  { %v928_v4 = vmul.f32 %v926_v1, %v905_v54 }
 0x249   :  { %v1233_v2 = vpop.eup %1232 }
 0x24a   :  { %v927_v3 = vmul.f32 %v1233_v2, %v911_v58  ;;  %v375_v58 = vrot.slane %v356_v34, %v1541_v33 }
 0x24c   :  { %v929_v5 = vmul.f32 %v927_v3, %v909_v57  ;;  %v383_v3 = vrot.slane %v366_v47, %v1541_v33 }
 0x24e   :  { %v930_v6 = vpack.c.bf16 %v929_v5, %v928_v4  ;;  %v395_v4 = vrot.slane %v365_v51, %v1541_v33  ;;  %v367_v5 = vcombine.high %v363_v49, %v363_v49 }
 0x250   :  { %1181 = vmatmul.mubr.bf16.vlgmr.msra.gmra.mxu1 %v930_v6 }
 0x286   :  { %v171_v22 = vpop.permute.xlu1 %170  ;;  %v165_v23 = vpop.permute.xlu0 %164 }
 0x287   :  { %v182_v29 = vcombine.low %v1509_v46, %v171_v22  ;;  %v183_v30 = vcombine.high %v1509_v46, %v171_v22  ;;  %v371_v46 = vrot.slane %v342_v27, %v1541_v33 }
 0x289   :  { %v190_v41 = vrot.slane %v182_v29, %v189_v28  ;;  %v197_v42 = vrot.slane %v183_v30, %v189_v28 }
 0x28a   :  { %v177_v31 = vpop.permute.xlu0 %176  ;;  %v167_v32 = vpop.permute.xlu1 %166 }
 0x28b   :  { %v198_v37 = vcombine.low %v165_v23, %v177_v31  ;;  %v199_v38 = vcombine.high %v165_v23, %v177_v31  ;;  %v399_v23 = vrot.slane %v367_v5, %v1541_v33 }
 0x28d   :  { %v206_v43 = vrot.slane %v198_v37, %v189_v28  ;;  %v213_v44 = vrot.slane %v199_v38, %v189_v28 }
 0x28e   :  { %v173_v45 = vpop.permute.xlu1 %172 }
 0x28f   :  { %v214_v53 = vcombine.low %v190_v41, %v206_v43  ;;  %v215_v54 = vcombine.high %v190_v41, %v206_v43  ;;  %v230_v55 = vcombine.low %v197_v42, %v213_v44  ;;  %v231_v56 = vcombine.high %v197_v42, %v213_v44 }
 0x290   :  { %v250_v57 = vcombine.low %v1514_v48, %v173_v45  ;;  %v251_v61 = vcombine.high %v1514_v48, %v173_v45 }
 0x291   :  { %v222_v62 = vrot.slane %v214_v53, %v221_v39  ;;  %v229_v63 = vrot.slane %v215_v54, %v221_v39  ;;  %v238_v0 = vrot.slane %v230_v55, %v221_v39  ;;  %v245_v2 = vrot.slane %v231_v56, %v221_v39  ;;  %v1638_v53 = vpop.permute.xlu0 %809  ;;  %v1642_v56 = vld [vmem:[#allocation5] sm:$0xff] }
 0x292   :  { %v179_v1 = vpop.permute.xlu1 %178  ;;  %v258_v10 = vrot.slane %v250_v57, %v189_v28  ;;  %v265_v16 = vrot.slane %v251_v61, %v189_v28  ;;  %v554_v61 = vcombine.high %v1642_v56, %v1642_v56 }
 0x293   :  { %v266_v6 = vcombine.low %v167_v32, %v179_v1  ;;  %v267_v7 = vcombine.high %v167_v32, %v179_v1  ;;  %440 = vrot.lane.b32.xlu0 %v222_v62, %s1350_s7  ;;  %v246_v8 = vcombine.high %v222_v62, %v1344_v15  ;;  %v247_v9 = vcombine.high %v229_v63, %v1344_v15 }
 0x294   :  { %v248_v48 = vcombine.high %v238_v0, %v1344_v15  ;;  %v1558_v11 = vmul.f32 %v371_v46, %v222_v62  ;;  %v249_v20 = vcombine.high %v245_v2, %v1344_v15  ;;  %v1565_v21 = vmul.f32 %v379_v59, %v229_v63 }
 0x295   :  { %v274_v17 = vrot.slane %v266_v6, %v189_v28  ;;  %v281_v18 = vrot.slane %v267_v7, %v189_v28  ;;  %442 = vrot.lane.b32.xlu1 %v246_v8, %s1350_s7  ;;  %v1562_v19 = vmul.f32 %v375_v58, %v246_v8  ;;  %v1567_v22 = vmul.f32 %v383_v3, %v247_v9 }
 0x296   :  { %v1571_v29 = vmul.f32 %v387_v60, %v238_v0  ;;  %v1573_v28 = vmul.f32 %v391_v14, %v248_v48  ;;  %v1575_v30 = vmul.f32 %v395_v4, %v245_v2  ;;  %v1578_v36 = vmul.f32 %v399_v23, %v249_v20  ;;  %v1640_v54 = vpop.permute.xlu1 %811 }
 0x297   :  { %v282_v24 = vcombine.low %v258_v10, %v274_v17  ;;  %v283_v25 = vcombine.high %v258_v10, %v274_v17  ;;  %v298_v26 = vcombine.low %v265_v16, %v281_v18  ;;  %v299_v27 = vcombine.high %v265_v16, %v281_v18  ;;  %444 = vrot.lane.b32.xlu0 %v229_v63, %s1350_s7 }
 0x299   :  { %446 = vrot.lane.b32.xlu1 %v247_v9, %s1350_s7  ;;  %v290_v31 = vrot.slane %v282_v24, %v221_v39  ;;  %v297_v32 = vrot.slane %v283_v25, %v221_v39  ;;  %v306_v34 = vrot.slane %v298_v26, %v221_v39  ;;  %v313_v35 = vrot.slane %v299_v27, %v221_v39 }
 0x29b   :  { %448 = vrot.lane.b32.xlu0 %v238_v0, %s1350_s7  ;;  %v314_v37 = vcombine.high %v290_v31, %v1344_v15  ;;  %v315_v38 = vcombine.high %v297_v32, %v1344_v15  ;;  %v316_v40 = vcombine.high %v306_v34, %v1344_v15  ;;  %v317_v41 = vcombine.high %v313_v35, %v1344_v15 }
 0x29c   :  { %v1585_v42 = vmul.f32 %v371_v46, %v290_v31  ;;  %v1590_v44 = vmul.f32 %v379_v59, %v297_v32  ;;  %v1594_v45 = vmul.f32 %v387_v60, %v306_v34  ;;  %v1598_v49 = vmul.f32 %v395_v4, %v313_v35 }
 0x29d   :  { %450 = vrot.lane.b32.xlu1 %v248_v48, %s1350_s7  ;;  %v1588_v43 = vmul.f32 %v375_v58, %v314_v37  ;;  %v1592_v39 = vmul.f32 %v383_v3, %v315_v38  ;;  %v1596_v47 = vmul.f32 %v391_v14, %v316_v40  ;;  %v1601_v51 = vmul.f32 %v399_v23, %v317_v41 }
 0x29e   :  { %v1131_v15 = vpack.c.bf16 %v1519_v50, %v1519_v50  ;;  %v1132_v46 = vpack.c.bf16 %v1524_v52, %v1524_v52  ;;  %v561_v59 = vrot.slane %v1642_v56, %v1529_v12  ;;  %v568_v3 = vrot.slane %v554_v61, %v1529_v12 }
 0x29f   :  { %452 = vrot.lane.b32.xlu0 %v245_v2, %s1350_s7 }
 0x2a0   :  { %v577_v1 = vrot.slane %v561_v59, %v1529_v12  ;;  %v584_v26 = vrot.slane %v568_v3, %v1529_v12 }
 0x2a1   :  { %454 = vrot.lane.b32.xlu1 %v249_v20, %s1350_s7 }
 0x2a3   :  { %488 = vrot.lane.b32.xlu0 %v222_v62, %s1354_s18 }
 0x2a5   :  { %490 = vrot.lane.b32.xlu1 %v246_v8, %s1354_s18  ;;  %v1653_v8 = vrot.slane %v577_v1, %v1541_v33 }
 0x2a7   :  { %492 = vrot.lane.b32.xlu0 %v229_v63, %s1354_s18  ;;  %v569_v63 = vcombine.high %v561_v59, %v561_v59 }
 0x2a9   :  { %494 = vrot.lane.b32.xlu1 %v247_v9, %s1354_s18  ;;  %v591_v5 = vrot.slane %v569_v63, %v1529_v12  ;;  %v599_v9 = vcombine.high %v577_v1, %v577_v1 }
 0x2ab   :  { %496 = vrot.lane.b32.xlu0 %v238_v0, %s1354_s18  ;;  %v1657_v16 = vrot.slane %v591_v5, %v1541_v33  ;;  %v601_v17 = vcombine.high %v591_v5, %v591_v5  ;;  %v1662_v25 = vrot.slane %v599_v9, %v1541_v33 }
 0x2ad   :  { %498 = vrot.lane.b32.xlu1 %v248_v48, %s1354_s18  ;;  %v570_v48 = vcombine.high %v568_v3, %v568_v3 }
 0x2af   :  { %500 = vrot.lane.b32.xlu0 %v245_v2, %s1354_s18 }
 0x2b1   :  { %502 = vrot.lane.b32.xlu1 %v249_v20, %s1354_s18 }
 0x2b3   :  { %456 = vrot.lane.b32.xlu0 %v290_v31, %s1350_s7 }
 0x2b5   :  { %458 = vrot.lane.b32.xlu1 %v314_v37, %s1350_s7 }
 0x2b7   :  { %460 = vrot.lane.b32.xlu0 %v297_v32, %s1350_s7 }
 0x2b9   :  { %462 = vrot.lane.b32.xlu1 %v315_v38, %s1350_s7 }
 0x2bb   :  { %464 = vrot.lane.b32.xlu0 %v306_v34, %s1350_s7 }
 0x2bd   :  { %466 = vrot.lane.b32.xlu1 %v316_v40, %s1350_s7 }
 0x2bf   :  { %468 = vrot.lane.b32.xlu0 %v313_v35, %s1350_s7 }
 0x2c1   :  { %470 = vrot.lane.b32.xlu1 %v317_v41, %s1350_s7 }
 0x2c3   :  { %504 = vrot.lane.b32.xlu0 %v290_v31, %s1354_s18  ;;  %v598_v31 = vrot.slane %v570_v48, %v1529_v12 }
 0x2c5   :  { %506 = vrot.lane.b32.xlu1 %v314_v37, %s1354_s18  ;;  %v1670_v37 = vrot.slane %v601_v17, %v1541_v33  ;;  %v602_v63 = vcombine.high %v598_v31, %v598_v31 }
 0x2c7   :  { %508 = vrot.lane.b32.xlu0 %v297_v32, %s1354_s18 }
 0x2c9   :  { %510 = vrot.lane.b32.xlu1 %v315_v38, %s1354_s18 }
 0x2cb   :  { %512 = vrot.lane.b32.xlu0 %v306_v34, %s1354_s18 }
 0x2cd   :  { %514 = vrot.lane.b32.xlu1 %v316_v40, %s1354_s18 }
 0x2cf   :  { %516 = vrot.lane.b32.xlu0 %v313_v35, %s1354_s18 }
 0x2d1   :  { %518 = vrot.lane.b32.xlu1 %v317_v41, %s1354_s18 }
 0x2d3   :  { %815 = vrot.lane.b32.xlu0 %v1519_v50, %s1354_s18 }
 0x2d5   :  { %817 = vrot.lane.b32.xlu1 %v1524_v52, %s1354_s18 }
 0x2d7   :  { %839 = vrot.lane.b32.xlu0 %v1131_v15, %s1348_s17 }
 0x2d9   :  { %841 = vrot.lane.b32.xlu1 %v1132_v46, %s1348_s17  ;;  %v1676_v46 = vrot.slane %v584_v26, %v1541_v33 }
 0x305   :  { %v441_v55 = vpop.permute.xlu0 %440 }
 0x307   :  { %v443_v57 = vpop.permute.xlu1 %442 }
 0x309   :  { %v445_v58 = vpop.permute.xlu0 %444 }
 0x30b   :  { %v447_v60 = vpop.permute.xlu1 %446 }
 0x30d   :  { %v449_v62 = vpop.permute.xlu0 %448 }
 0x30f   :  { %v451_v0 = vpop.permute.xlu1 %450 }
 0x310   :  { %v1029_v2 = vpop.f32.mrf.mxu1 }
 0x311   :  { %1036 = vst.msk [vmem:[#allocation10] sm:$0xff] %vm62_vm0, %v1029_v2  ;;  %v453_v4 = vpop.permute.xlu0 %452 }
 0x312   :  { %v1182_v6 = vpop.f32.mrf.mxu1 }
 0x313   :  { %v455_v7 = vpop.permute.xlu1 %454 }
 0x314   :  { %v1032_v10 = vpop.f32.mrf.mxu1 }
 0x315   :  { %1037 = vst.msk [vmem:[#allocation10 + $0x8] sm:$0xff] %vm62_vm0, %v1032_v10  ;;  %v489_v14 = vpop.permute.xlu0 %488 }
 0x316   :  { %v537_v18 = vsel %vm536_vm2, %v441_v55, %v489_v14  ;;  %v1183_v20 = vpop.f32.mrf.mxu1  ;;  %v600_v55 = vcombine.high %v584_v26, %v584_v26 }
 0x317   :  { %v643_v23 = vmul.f32 %v1653_v8, %v537_v18  ;;  %v491_v24 = vpop.permute.xlu1 %490 }
 0x318   :  { %v538_v27 = vsel %vm536_vm2, %v443_v57, %v491_v24 }
 0x319   :  { %v659_v32 = vadd.f32 %v643_v23, %v1558_v11  ;;  %v644_v34 = vmul.f32 %v1657_v16, %v538_v27  ;;  %v493_v35 = vpop.permute.xlu0 %492  ;;  %v1680_v11 = vrot.slane %v598_v31, %v1541_v33 }
 0x31a   :  { %v539_v38 = vsel %vm536_vm2, %v445_v58, %v493_v35 }
 0x31b   :  { %v660_v40 = vadd.f32 %v644_v34, %v1562_v19  ;;  %v645_v41 = vmul.f32 %v1662_v25, %v539_v38  ;;  %v495_v15 = vpop.permute.xlu1 %494 }
 0x31c   :  { %v540_v12 = vsel %vm536_vm2, %v447_v60, %v495_v15  ;;  %v1688_v60 = vrot.slane %v600_v55, %v1541_v33 }
 0x31d   :  { %v691_v57 = vcombine.low %v659_v32, %v660_v40  ;;  %v661_v59 = vadd.f32 %v645_v41, %v1565_v21  ;;  %v646_v61 = vmul.f32 %v1670_v37, %v540_v12  ;;  %v497_v58 = vpop.permute.xlu0 %496 }
 0x31e   :  { %v541_v19 = vsel %vm536_vm2, %v449_v62, %v497_v58 }
 0x31f   :  { %v1123_v1 = vpack.c.bf16 %v691_v57, %v691_v57  ;;  %v662_v2 = vadd.f32 %v646_v61, %v1567_v22  ;;  %v647_v3 = vmul.f32 %v1676_v46, %v541_v19  ;;  %v499_v5 = vpop.permute.xlu1 %498  ;;  %v634_v22 = vrot.slane %v602_v63, %v1541_v33 }
 0x320   :  { %v542_v6 = vsel %vm536_vm2, %v451_v0, %v499_v5 }
 0x321   :  { %740 = vst.msk [vmem:[%s1794_s8] sm:$0xf] %vm739_vm3, %v1123_v1  ;;  %v692_v21 = vcombine.low %v661_v59, %v662_v2  ;;  %v663_v9 = vadd.f32 %v647_v3, %v1571_v29  ;;  %v648_v62 = vmul.f32 %v1680_v11, %v542_v6  ;;  %v501_v10 = vpop.permute.xlu0 %500 }
 0x322   :  { %v543_v48 = vsel %vm536_vm2, %v453_v4, %v501_v10 }
 0x323   :  { %v1124_v14 = vpack.c.bf16 %v692_v21, %v692_v21  ;;  %v664_v17 = vadd.f32 %v648_v62, %v1573_v28  ;;  %v649_v0 = vmul.f32 %v1688_v60, %v543_v48  ;;  %v503_v18 = vpop.permute.xlu1 %502 }
 0x324   :  { %v544_v20 = vsel %vm536_vm2, %v455_v7, %v503_v18 }
 0x325   :  { %741 = vst.msk [vmem:[%s1794_s8 + $0x4] sm:$0xf] %vm739_vm3, %v1124_v14  ;;  %v693_v29 = vcombine.low %v663_v9, %v664_v17  ;;  %v665_v23 = vadd.f32 %v649_v0, %v1575_v30  ;;  %v650_v24 = vmul.f32 %v634_v22, %v544_v20  ;;  %v457_v33 = vpop.permute.xlu0 %456 }
 0x327   :  { %v1125_v26 = vpack.c.bf16 %v693_v29, %v693_v29  ;;  %v666_v4 = vadd.f32 %v650_v24, %v1578_v36  ;;  %v459_v27 = vpop.permute.xlu1 %458 }
 0x329   :  { %742 = vst.msk [vmem:[%s1794_s8 + $0x8] sm:$0xf] %vm739_vm3, %v1125_v26  ;;  %v694_v28 = vcombine.low %v665_v23, %v666_v4  ;;  %v461_v7 = vpop.permute.xlu0 %460 }
 0x32b   :  { %v1126_v31 = vpack.c.bf16 %v694_v28, %v694_v28  ;;  %v463_v32 = vpop.permute.xlu1 %462 }
 0x32d   :  { %743 = vst.msk [vmem:[%s1794_s8 + $0xc] sm:$0xf] %vm739_vm3, %v1126_v31  ;;  %v465_v30 = vpop.permute.xlu0 %464 }
 0x32f   :  { %v467_v34 = vpop.permute.xlu1 %466 }
 0x331   :  { %v469_v35 = vpop.permute.xlu0 %468 }
 0x333   :  { %v471_v38 = vpop.permute.xlu1 %470 }
 0x335   :  { %v505_v36 = vpop.permute.xlu0 %504 }
 0x336   :  { %v545_v40 = vsel %vm536_vm2, %v457_v33, %v505_v36 }
 0x337   :  { %v651_v41 = vmul.f32 %v1653_v8, %v545_v40  ;;  %v507_v15 = vpop.permute.xlu1 %506 }
 0x338   :  { %v546_v55 = vsel %vm536_vm2, %v459_v27, %v507_v15 }
 0x339   :  { %v667_v12 = vadd.f32 %v651_v41, %v1585_v42  ;;  %v652_v57 = vmul.f32 %v1657_v16, %v546_v55  ;;  %v509_v59 = vpop.permute.xlu0 %508 }
 0x33a   :  { %v547_v61 = vsel %vm536_vm2, %v461_v7, %v509_v59 }
 0x33b   :  { %v668_v58 = vadd.f32 %v652_v57, %v1588_v43  ;;  %v653_v63 = vmul.f32 %v1662_v25, %v547_v61  ;;  %v511_v19 = vpop.permute.xlu1 %510 }
 0x33c   :  { %v548_v1 = vsel %vm536_vm2, %v463_v32, %v511_v19 }
 0x33d   :  { %v695_v2 = vcombine.low %v667_v12, %v668_v58  ;;  %v669_v8 = vadd.f32 %v653_v63, %v1590_v44  ;;  %v654_v3 = vmul.f32 %v1670_v37, %v548_v1  ;;  %v513_v5 = vpop.permute.xlu0 %512 }
 0x33e   :  { %v549_v42 = vsel %vm536_vm2, %v465_v30, %v513_v5 }
 0x33f   :  { %v1127_v6 = vpack.c.bf16 %v695_v2, %v695_v2  ;;  %v670_v16 = vadd.f32 %v654_v3, %v1592_v39  ;;  %v655_v21 = vmul.f32 %v1676_v46, %v549_v42  ;;  %v515_v9 = vpop.permute.xlu1 %514 }
 0x340   :  { %v550_v43 = vsel %vm536_vm2, %v467_v34, %v515_v9 }
 0x341   :  { %744 = vst.msk [vmem:[%s1794_s8 + $0x10] sm:$0xf] %vm739_vm3, %v1127_v6  ;;  %v696_v25 = vcombine.low %v669_v8, %v670_v16  ;;  %v671_v44 = vadd.f32 %v655_v21, %v1594_v45  ;;  %v656_v37 = vmul.f32 %v1680_v11, %v550_v43  ;;  %v517_v62 = vpop.permute.xlu0 %516 }
 0x342   :  { %v551_v10 = vsel %vm536_vm2, %v469_v35, %v517_v62 }
 0x343   :  { %v1128_v48 = vpack.c.bf16 %v696_v25, %v696_v25  ;;  %v672_v39 = vadd.f32 %v656_v37, %v1596_v47  ;;  %v657_v46 = vmul.f32 %v1688_v60, %v551_v10  ;;  %v519_v14 = vpop.permute.xlu1 %518  ;;  %v805_v47 = vmul.f32 %v1519_v50, %v1531_v13 }
 0x344   :  { %v552_v17 = vsel %vm536_vm2, %v471_v38, %v519_v14 }
 0x345   :  { %745 = vst.msk [vmem:[%s1794_s8 + $0x14] sm:$0xf] %vm739_vm3, %v1128_v48  ;;  %v697_v0 = vcombine.low %v671_v44, %v672_v39  ;;  %v673_v45 = vadd.f32 %v657_v46, %v1598_v49  ;;  %v658_v11 = vmul.f32 %v634_v22, %v552_v17  ;;  %v816_v18 = vpop.permute.xlu0 %815  ;;  %v806_v49 = vmul.f32 %v1524_v52, %v1531_v13 }
 0x346   :  { %v821_v20 = vsel %vm536_vm2, %v1638_v53, %v816_v18 }
 0x347   :  { %v1129_v60 = vpack.c.bf16 %v697_v0, %v697_v0  ;;  %v674_v29 = vadd.f32 %v658_v11, %v1601_v51  ;;  %v823_v23 = vmul.f32 %v821_v20, %v1642_v56  ;;  %v818_v24 = vpop.permute.xlu1 %817 }
 0x348   :  { %v822_v33 = vsel %vm536_vm2, %v1640_v54, %v818_v24 }
 0x349   :  { %746 = vst.msk [vmem:[%s1794_s8 + $0x18] sm:$0xf] %vm739_vm3, %v1129_v60  ;;  %v698_v50 = vcombine.low %v673_v45, %v674_v29  ;;  %v825_v51 = vadd.f32 %v823_v23, %v805_v47  ;;  %v824_v53 = vmul.f32 %v822_v33, %v1642_v56  ;;  %v840_v22 = vpop.permute.xlu0 %839 }
 0x34a   :  { %845 = vst.msk [vmem:[#allocation8] sm:$0xf] %vm739_vm3, %v840_v22 }
 0x34b   :  { %v1130_v54 = vpack.c.bf16 %v698_v50, %v698_v50  ;;  %v827_v26 = vpack.c.bf16 %v825_v51, %v825_v51  ;;  %v826_v4 = vadd.f32 %v824_v53, %v806_v49  ;;  %v842_v27 = vpop.permute.xlu1 %841 }
 0x34c   :  { %846 = vst.msk [vmem:[#allocation8 + $0x4] sm:$0xf] %vm739_vm3, %v842_v27 }
 0x34d   :  { %747 = vst.msk [vmem:[%s1794_s8 + $0x1c] sm:$0xf] %vm739_vm3, %v1130_v54  ;;  %829 = vst.msk [vmem:[#allocation7] sm:$0xf] %vm739_vm3, %v827_v26  ;;  %v828_v52 = vpack.c.bf16 %v826_v4, %v826_v4 }
 0x34e   :  { %1285 = shalt.err (!%p1282_p0)
}
 0x34f   :  { %s1358_s17 = smov 64   ;;  %s1359_s1 = smov 4  }
 0x350   :  { %1063 = dma.vmem_to_hbm [thread:$0]  %s1058_s29, 128, %s1796_s10, [#allocation9], %s1358_s17, %s1358_s17, %s1359_s1  }
 0x351   :  { %s1294_s20 = scalar_lea.vmem %s1070_s3, 256  ;;  %p1299_p2 = scmp.lt.s32.totalorder %s1070_s3, %s1070_s3 }
 0x352   :  { %p1295_p1 = scmp.ne.s32.totalorder %s1070_s3, %s1294_s20  ;;  %p1300_p3 = scmp.lt.s32.totalorder %s1294_s20, %s1294_s20 }
 0x354   :  { %p1301_p4 = por %p1300_p3, %p1299_p2 }
 0x356   :  { %p1302_p5 = pnand %p1301_p4, %p1295_p1 }
 0x358   :  { %1305 = shalt.err (!%p1302_p5)
}
 0x359   :  { %s1360_s8 = smov 128   ;;  %830 = vst.msk [vmem:[#allocation7 + $0x4] sm:$0xf] %vm739_vm3, %v828_v52  ;;  %s1314_s5 = scalar_lea.vmem %s1763_s13, 128 }
 0x35a   :  { %1075 = dma.vmem_to_hbm [thread:$0]  %s1070_s3, 256, %s1797_s11, [#allocation9], %s1360_s8, %s1360_s8, %s1354_s18  }
 0x35b   :  { %p1315_p6 = scmp.ne.s32.totalorder %s1763_s13, %s1314_s5  ;;  %p1319_p7 = scmp.lt.s32.totalorder %s1763_s13, %s1763_s13 }
 0x35c   :  { %p1320_p8 = scmp.lt.s32.totalorder %s1314_s5, %s1314_s5 }
 0x35e   :  { %p1321_p9 = por %p1320_p8, %p1319_p7 }
 0x360   :  { %p1322_p10 = pnand %p1321_p9, %p1315_p6 }
 0x362   :  { %1325 = shalt.err (!%p1322_p10)
}
 0x363   :  { %1051 = dma.vmem_to_hbm [thread:$0]  %s1763_s13, 128, %s1795_s9, [#allocation4], %s1358_s17, %s1358_s17, %s1359_s1  }
 0x364   :  { %1338 = dma.done.wait [#allocation4], 128  }
 0x365   :  { %1339 = vsyncadd [#allocation4], 4294967168 }
 0x366   :  { %1340 = dma.done.wait [#allocation9], 384  }
 0x367   :  { %1341 = vsyncadd [#allocation9], 4294966912 }
 0x368   :  { %1087 = vsyncpa [#allocation3], 1 }
 0x369   :  { %1088 = vsyncpa [#allocation6], 1 }
 0x36a   :  { %1089 = vsyncpa [#allocation4], 1 }
 0x36b   :  { %1090 = vsyncpa [#allocation9], 1 }

</bundles_post_ra>
